<compile_context>
chip_gen: v7x
topology: tpu7x:2x2x1
jax: 0.10.0
libtpu: 0.0.40
codegen_flags: <defaults>
</compile_context>

<pallas_src>
import functools

import jax
import jax.numpy as jnp
from jax.experimental import pallas as pl
from jax.experimental.pallas import tpu as pltpu

n_embd = 384
block_size = 256  # reference buffer size; only the [:T, :T] slice is ever used


def _head_kernel(x_ref, wqkv_ref, o_ref, *, head_size, bb):
    # x_ref:    (bb, T, C)        f32   (cast to bf16 after the block DMA)
    # wqkv_ref: (C, qkv_pad)      bf16  (columns: [q*scale | k | v | zero-pad])
    # o_ref:    (bb, T, out_pad)  bf16  (only the first head_size lanes are meaningful)
    T = x_ref.shape[1]
    C = x_ref.shape[2]
    hs = head_size
    out_pad = o_ref.shape[2]

    # Fused QKV projection as a single 2-D matmul with M = bb*T rows, one N lane tile.
    # x arrives f32 (cheaper HBM path than a standalone convert); bf16 for the MXU.
    x2 = x_ref[...].reshape(bb * T, C).astype(jnp.bfloat16)
    qkv = jnp.dot(x2, wqkv_ref[...],
                  preferred_element_type=jnp.float32)                   # (bb*T, qkv_pad) f32
    qkv = qkv.reshape(bb, T, -1)

    # 1/sqrt(head_size) is already folded into the query weight columns.
    q = qkv[:, :, 0 * hs:1 * hs].astype(jnp.bfloat16)
    k = qkv[:, :, 1 * hs:2 * hs].astype(jnp.bfloat16)
    v = qkv[:, :, 2 * hs:3 * hs].astype(jnp.bfloat16)

    # Scores: batched q @ k^T, contracting the last dim of both (no k.T materialized).
    s = jnp.einsum('btd,bsd->bts', q, k,
                   preferred_element_type=jnp.float32)                  # (bb, T, T) f32

    # 2-D causal additive bias; broadcasting (T, T) against (bb, T, T) is free.
    row = jax.lax.broadcasted_iota(jnp.int32, (T, T), 0)
    col = jax.lax.broadcasted_iota(jnp.int32, (T, T), 1)
    bias = jnp.where(col <= row, 0.0, -1e30).astype(jnp.float32)        # (T, T)
    s = s + bias

    # Numerically stable softmax; normalization deferred until after P@V.
    m = jnp.max(s, axis=-1, keepdims=True)
    p = jnp.exp(s - m)                                                  # (bb, T, T) f32
    l = jnp.sum(p, axis=-1, keepdims=True)                              # (bb, T, 1)  f32, >= 1

    # TODO(synk): training-mode dropout on the attention matrix not implemented (eval mode).

    out = jnp.einsum('bts,bsd->btd', p.astype(jnp.bfloat16), v,
                     preferred_element_type=jnp.float32)                # (bb, T, hs) f32
    # EUP reciprocal + cheap VPU muls on (T, hs) instead of T*T divides.
    out = out * pl.reciprocal(l, approx=True)

    # Lane-dense bf16 writeback; zero the pad lanes so consumers of the padded slab are safe.
    if hs == out_pad:
        o_ref[...] = out.astype(o_ref.dtype)
    else:
        o_ref[:, :, :hs] = out.astype(o_ref.dtype)
        o_ref[:, :, hs:] = jnp.zeros((bb, T, out_pad - hs), o_ref.dtype)


def prepare_qkv_weight(w_key, w_query, w_value):
    """Build the fused bf16 QKV weight once at init.

    Columns: [w_query * head_size**-0.5 | w_key | w_value], packed contiguously and
    zero-padded so the total column count is a multiple of 128 (one lane tile for
    head_size <= 42)."""
    head_size = w_key.shape[1]
    scale = head_size ** (-0.5)
    wqkv = jnp.concatenate([w_query * scale, w_key, w_value], axis=1)   # (C, 3*hs)
    qkv_pad = ((3 * head_size + 127) // 128) * 128
    wqkv = jnp.pad(wqkv, ((0, 0), (0, qkv_pad - 3 * head_size)))
    return wqkv.astype(jnp.bfloat16)


def _estimate_vmem_bytes(bb, T, C, qkv_pad, out_pad):
    f32, bf16 = 4, 2
    b = 2 * bb * T * C * f32            # double-buffered f32 x input blocks
    b += 2 * bb * T * out_pad * bf16    # double-buffered bf16 output blocks
    b += 2 * C * qkv_pad * bf16         # fused weight (pipeline double-buffers it)
    b += bb * T * C * bf16              # x cast to bf16
    b += bb * T * qkv_pad * (f32 + bf16)  # f32 qkv + bf16 q/k/v slices
    b += 2 * bb * T * T * f32           # scores + exp(p)
    b += bb * T * out_pad * f32         # f32 attention output before the bf16 cast
    return b


def _pick_batch_block(B, T, C, qkv_pad, out_pad, budget=12 * 1024 * 1024):
    # Largest bb whose live intermediates fit a conservative VMEM budget (safe under the
    # v5e 16 MiB default scoped limit and v7x's 64 MiB physical VMEM), while keeping the
    # grid length even (both v7x TensorCores get balanced work) and >= 4 when B allows
    # (more steps for the software pipeline to hide DMA).
    best = 1
    for bb in range(1, min(8, B) + 1):
        if B % bb:
            continue
        if _estimate_vmem_bytes(bb, T, C, qkv_pad, out_pad) > budget:
            continue
        g = B // bb
        if B >= 2 and (g < 2 or g % 2):
            continue
        if B >= 8 and g < 4:
            continue
        best = bb
    return best


def head_forward_padded(x, wqkv_bf, head_size, *, batch_block=None):
    """x: (B, T, C) float32; wqkv_bf: prepared (C, qkv_pad) bf16 fused weight.

    Returns a lane-dense bf16 (B, T, out_pad) slab; only the first head_size lanes are
    meaningful (the rest are zero).  Multi-head / downstream-matmul consumers should use
    this padded slab directly instead of slicing."""
    B, T, C = x.shape
    assert C == n_embd
    assert T <= block_size
    assert head_size <= 128
    qkv_pad = wqkv_bf.shape[1]
    out_pad = ((head_size + 127) // 128) * 128

    bb = _pick_batch_block(B, T, C, qkv_pad, out_pad) if batch_block is None else batch_block
    assert B % bb == 0

    kernel = functools.partial(_head_kernel, head_size=head_size, bb=bb)

    return pl.pallas_call(
        kernel,
        out_shape=jax.ShapeDtypeStruct((B, T, out_pad), jnp.bfloat16),
        grid_spec=pltpu.PrefetchScalarGridSpec(
            num_scalar_prefetch=0,
            grid=(B // bb,),
            in_specs=[
                pl.BlockSpec((bb, T, C), lambda b: (b, 0, 0)),
                pl.BlockSpec((C, qkv_pad), lambda b: (0, 0)),
            ],
            out_specs=pl.BlockSpec((bb, T, out_pad), lambda b: (b, 0, 0)),
        ),
        compiler_params=pltpu.CompilerParams(
            dimension_semantics=("parallel",),
            vmem_limit_bytes=32 * 1024 * 1024,
        ),
    )(x, wqkv_bf)


def head_forward(x, w_key, w_query, w_value, *, batch_block=None):
    """Convenience entry point matching the original module signature: returns
    (B, T, head_size) in x.dtype.  Production callers should call prepare_qkv_weight()
    once at init and consume head_forward_padded()'s slab directly."""
    head_size = w_key.shape[1]
    wqkv_bf = prepare_qkv_weight(w_key, w_query, w_value)
    out_padded = head_forward_padded(x, wqkv_bf, head_size, batch_block=batch_block)
    return out_padded[:, :, :head_size].astype(x.dtype)


def _init_linear_weight(key, in_features, out_features):
    # Deterministic init mimicking nn.Linear default (uniform +/- 1/sqrt(in)).
    # Stored transposed relative to PyTorch: shape (in, out) so the kernel does x @ W.
    bound = 1.0 / (in_features ** 0.5)
    return jax.random.uniform(
        key, (in_features, out_features), dtype=jnp.float32,
        minval=-bound, maxval=bound)


def _reference(x, w_key, w_query, w_value, head_size):
    k = x @ w_key
    q = x @ w_query
    v = x @ w_value
    wei = (q @ jnp.swapaxes(k, -2, -1)) * head_size ** (-0.5)
    T = x.shape[1]
    mask = jnp.tril(jnp.ones((T, T), dtype=bool))
    wei = jnp.where(mask, wei, -jnp.inf)
    wei = jax.nn.softmax(wei, axis=-1)
    return wei @ v


if __name__ == "__main__":
    head_size = 32
    root = jax.random.PRNGKey(0)

    # (B, T) cases: the small spec-sized case and one that exercises the multi-batch
    # (bb > 1) grid-step path.
    for (B, T) in [(2, 8), (8, 64)]:
        kx, kk, kq, kv, root = jax.random.split(root, 5)
        x = jax.random.normal(kx, (B, T, n_embd), dtype=jnp.float32)
        w_key = _init_linear_weight(kk, n_embd, head_size)
        w_query = _init_linear_weight(kq, n_embd, head_size)
        w_value = _init_linear_weight(kv, n_embd, head_size)

        # Weight fusion/cast done once at init (hoisted out of the forward path).
        wqkv_bf = prepare_qkv_weight(w_key, w_query, w_value)

        out_padded = jax.block_until_ready(head_forward_padded(x, wqkv_bf, head_size))
        assert out_padded.shape == (B, T, 128)
        out = out_padded[:, :, :head_size].astype(jnp.float32)

        ref = _reference(x, w_key, w_query, w_value, head_size)
        assert out.shape == (B, T, head_size)
        # bf16 MXU operands/output + approx reciprocal -> loosened tolerance vs f32 ref.
        max_err = float(jnp.max(jnp.abs(out - ref)))
        assert jnp.allclose(out, ref, atol=5e-2, rtol=5e-2), max_err

    print("KERNEL_OK")
</pallas_src>

<mosaic_0001>
module attributes {stable_mosaic.version = 11 : i64} {
  func.func @_head_kernel(%arg0: i32, %arg1: memref<1x8x384xf32, #tpu.memory_space<vmem>>, %arg2: memref<384x128xbf16, #tpu.memory_space<vmem>>, %arg3: memref<1x8x128xbf16, #tpu.memory_space<vmem>>) attributes {dimension_semantics = [#tpu.dimension_semantics<parallel>], iteration_bounds = array<i64: 2>, scalar_prefetch = 0 : i64, scratch_operands = 0 : i64, tpu.core_type = #tpu.core_type<tc>, window_params = [{transform_indices = @transform_0, window_bounds = array<i64: 1, 8, 384>}, {pipeline_mode = #tpu.pipeline_mode<synchronous>, transform_indices = @transform_1, window_bounds = array<i64: 384, 128>}, {transform_indices = @transform_2, window_bounds = array<i64: 1, 8, 128>}]} {
    %c0 = arith.constant 0 : index
    %c0_0 = arith.constant 0 : index
    %c0_1 = arith.constant 0 : index
    %0 = vector.load %arg1[%c0, %c0_0, %c0_1] : memref<1x8x384xf32, #tpu.memory_space<vmem>>, vector<1x8x384xf32>
    %1 = vector.shape_cast %0 : vector<1x8x384xf32> to vector<8x384xf32>
    %2 = arith.truncf %1 : vector<8x384xf32> to vector<8x384xbf16>
    %c0_2 = arith.constant 0 : index
    %c0_3 = arith.constant 0 : index
    %3 = vector.load %arg2[%c0_2, %c0_3] : memref<384x128xbf16, #tpu.memory_space<vmem>>, vector<384x128xbf16>
    %cst = arith.constant dense<0.000000e+00> : vector<8x128xf32>
    %4 = tpu.matmul %2, %3, %cst {dimension_numbers = #tpu.dot_dimension_numbers<[1], [0], [0], [1], [0, 0, 1, 1], [], []>} : vector<8x384xbf16>, vector<384x128xbf16>, vector<8x128xf32> -> vector<8x128xf32>
    %5 = vector.shape_cast %4 : vector<8x128xf32> to vector<1x8x128xf32>
    %6 = vector.extract_strided_slice %5 {offsets = [0, 0, 0], sizes = [1, 8, 32], strides = [1, 1, 1]} : vector<1x8x128xf32> to vector<1x8x32xf32>
    %7 = arith.truncf %6 : vector<1x8x32xf32> to vector<1x8x32xbf16>
    %8 = vector.extract_strided_slice %5 {offsets = [0, 0, 32], sizes = [1, 8, 32], strides = [1, 1, 1]} : vector<1x8x128xf32> to vector<1x8x32xf32>
    %9 = arith.truncf %8 : vector<1x8x32xf32> to vector<1x8x32xbf16>
    %10 = vector.extract_strided_slice %5 {offsets = [0, 0, 64], sizes = [1, 8, 32], strides = [1, 1, 1]} : vector<1x8x128xf32> to vector<1x8x32xf32>
    %11 = arith.truncf %10 : vector<1x8x32xf32> to vector<1x8x32xbf16>
    "tpu.trace_start"() <{level = 10 : i32, message = "btd,bsd->bts"}> : () -> ()
    %cst_4 = arith.constant dense<0.000000e+00> : vector<1x8x8xf32>
    %12 = tpu.matmul %7, %9, %cst_4 {dimension_numbers = #tpu.dot_dimension_numbers<[2], [2], [1], [1], [0, 0, 0, 1, 1, 1], [0], [0]>} : vector<1x8x32xbf16>, vector<1x8x32xbf16>, vector<1x8x8xf32> -> vector<1x8x8xf32>
    "tpu.trace_stop"() : () -> ()
    %13 = tpu.iota {dimensions = array<i32: 0>} : vector<8x8xi32>
    %14 = tpu.iota {dimensions = array<i32: 1>} : vector<8x8xi32>
    %15 = arith.cmpi sle, %14, %13 : vector<8x8xi32>
    %cst_5 = arith.constant 0.000000e+00 : f32
    %cst_6 = arith.constant -1.000000e+30 : f32
    %16 = vector.broadcast %cst_5 : f32 to vector<8x8xf32>
    %17 = vector.broadcast %cst_6 : f32 to vector<8x8xf32>
    %18 = arith.select %15, %16, %17 : vector<8x8xi1>, vector<8x8xf32>
    %19 = vector.shape_cast %18 : vector<8x8xf32> to vector<1x8x8xf32>
    %20 = arith.addf %12, %19 : vector<1x8x8xf32>
    %cst_7 = arith.constant dense<0xFF800000> : vector<1x8xf32>
    %21 = vector.multi_reduction <maximumf>, %20, %cst_7 [2] : vector<1x8x8xf32> to vector<1x8xf32>
    %22 = vector.shape_cast %21 : vector<1x8xf32> to vector<1x8x1xf32>
    %23 = vector.broadcast %22 : vector<1x8x1xf32> to vector<1x8x8xf32>
    %24 = arith.subf %20, %23 : vector<1x8x8xf32>
    %25 = math.exp %24 : vector<1x8x8xf32>
    %cst_8 = arith.constant dense<0.000000e+00> : vector<1x8xf32>
    %26 = vector.multi_reduction <add>, %25, %cst_8 [2] : vector<1x8x8xf32> to vector<1x8xf32>
    %27 = vector.shape_cast %26 : vector<1x8xf32> to vector<1x8x1xf32>
    %28 = arith.truncf %25 : vector<1x8x8xf32> to vector<1x8x8xbf16>
    "tpu.trace_start"() <{level = 10 : i32, message = "bts,bsd->btd"}> : () -> ()
    %cst_9 = arith.constant dense<0.000000e+00> : vector<1x8x32xf32>
    %29 = tpu.matmul %28, %11, %cst_9 {dimension_numbers = #tpu.dot_dimension_numbers<[2], [1], [1], [2], [0, 0, 0, 1, 1, 2], [0], [0]>} : vector<1x8x8xbf16>, vector<1x8x32xbf16>, vector<1x8x32xf32> -> vector<1x8x32xf32>
    "tpu.trace_stop"() : () -> ()
    %30 = tpu.reciprocal %27 {approx = true} : vector<1x8x1xf32> -> vector<1x8x1xf32>
    %31 = vector.broadcast %30 : vector<1x8x1xf32> to vector<1x8x32xf32>
    %32 = arith.mulf %29, %31 : vector<1x8x32xf32>
    %33 = arith.truncf %32 : vector<1x8x32xf32> to vector<1x8x32xbf16>
    %c0_10 = arith.constant 0 : index
    %c0_11 = arith.constant 0 : index
    %c0_12 = arith.constant 0 : index
    %34 = vector.load %arg3[%c0_10, %c0_11, %c0_12] : memref<1x8x128xbf16, #tpu.memory_space<vmem>>, vector<1x8x32xbf16>
    tpu.vector_store %arg3[%c0_10, %c0_11, %c0_12], %33 {strides = array<i32>} : memref<1x8x128xbf16, #tpu.memory_space<vmem>>, vector<1x8x32xbf16>,
    %cst_13 = arith.constant 0.000000e+00 : bf16
    %35 = vector.broadcast %cst_13 : bf16 to vector<1x8x96xbf16>
    %c0_14 = arith.constant 0 : index
    %c0_15 = arith.constant 0 : index
    %c32 = arith.constant 32 : index
    %36 = vector.load %arg3[%c0_14, %c0_15, %c32] : memref<1x8x128xbf16, #tpu.memory_space<vmem>>, vector<1x8x96xbf16>
    tpu.vector_store %arg3[%c0_14, %c0_15, %c32], %35 {strides = array<i32>} : memref<1x8x128xbf16, #tpu.memory_space<vmem>>, vector<1x8x96xbf16>,
    return
  }
  func.func @transform_0(%arg0: i32) -> (i32, i32, i32) {
    %c0_i32 = arith.constant 0 : i32
    %c0_i32_0 = arith.constant 0 : i32
    %c0_i32_1 = arith.constant 0 : i32
    return %arg0, %c0_i32, %c0_i32_0 : i32, i32, i32
  }
  func.func @transform_1(%arg0: i32) -> (i32, i32) {
    %c0_i32 = arith.constant 0 : i32
    %c0_i32_0 = arith.constant 0 : i32
    %c0_i32_1 = arith.constant 0 : i32
    return %c0_i32, %c0_i32_0 : i32, i32
  }
  func.func @transform_2(%arg0: i32) -> (i32, i32, i32) {
    %c0_i32 = arith.constant 0 : i32
    %c0_i32_0 = arith.constant 0 : i32
    %c0_i32_1 = arith.constant 0 : i32
    return %arg0, %c0_i32, %c0_i32_0 : i32, i32, i32
  }
}

</mosaic_0001>

<bundles_post_ra>
// kernel: tpu_custom_call.1
= control target key start
LH: loop header
LB: loop body
LE: loop exit
PB: predicated region body
PF: predicated region fallthrough
CT: control target
= control target key end

     0   :  { %7 = vsyncpa [#allocation3], 0  ;;  %s1247_s0 = inlined_call_operand.hbm [shape: f32[2,8,384], index: 0, kind: input, shape index: {}]   ;;  %s1248_s1 = inlined_call_operand.hbm [shape: bf16[384,128], index: 1, kind: input, shape index: {}]   ;;  %s1249_s2 = inlined_call_operand.hbm [shape: bf16[2,8,128], index: 2, kind: output, shape index: {}]  }
   0x1   :  { %9 = vsyncpa [#allocation3 + $0x1], 0 }
   0x2   :  { %10 = vsyncpa [#allocation6], 0 }
   0x3   :  { %11 = vsyncpa [#allocation4], 0 }
   0x4   :  { %13 = vsyncpa [#allocation4 + $0x1], 0  ;;  %s1029_s9 = smov 0   ;;  %s1031_s10 = smov 0  }
   0x5   :  { %s1033_s11 = smov 0   ;;  %s1035_s12 = smov 0  }
   0x6 LB: > { %s1050_s13 = sadd.s32 4294967295, %s1001_s12   ;;  %s672_s14 = sadd.s32 4294967294, %s1001_s12   ;;  %s1001_s12 = sphi %s1035_s12, %s1269_s12   ;;  %s997_s11 = sphi %s1033_s11, %s1268_s11   ;;  %s993_s10 = sphi %s1031_s10, %s1267_s10   ;;  %s989_s9 = sphi %s1029_s9, %s1266_s9  }
   0x7   : > { %p39_p0 = scmp.ne.s32.totalorder %s993_s10, %s989_s9  ;;  %p1250_p1 = scmp.eq.s32.totalorder %s1050_s13, 0 }
   0x8   : > { %p90_p3 = scmp.eq.s32.totalorder %s672_s14, 1  ;;  %p673_p5 = scmp.ge.s32.totalorder %s1001_s12, 1 }
   0x9   : > { %p1059_p4 = por %p1250_p1, %p39_p0  ;;  %p97_p7 = scmp.lt.s32.totalorder %s1001_s12, 3 }
   0xa   : > { %p1064_p6 = por %p90_p3, %p39_p0  ;;  %s1003_s18 = smov [#allocation5]  }
   0xb   : > { %s1253_s15 = scalar_select %p1059_p4, 1, 0 }
   0xc   : > { %s1254_s16 = scalar_select %p1064_p6, 1, 0 }
   0xd   : > { %p1069_p8 = pnand %p673_p5, %p97_p7  ;;  %s109_s19 = sshll.u32 %s1003_s18, 4  ;;  %s1073_s19 = int_to_ptr.vmem [resolvable:$true] %s109_s19 }
   0xe   : > { %s1085_s21 = sadd.s32 1, %s1001_s12   ;;  %s26_s22 = sadd.s32 1, %s997_s11 }
   0xf   : > { %s1255_s17 = scalar_select %p1069_p8, 1, 0 }
  0x10   : > { %p788_p9 = pneg %p1069_p8  ;;  %s23_s23 = ssub.s32 %s1001_s12, %s1085_s21 }
  0x11   : > { %s873_s26 = scalar_lea.hbm %s1248_s1, 3072 }
  0x12   : > { %p1080_p11 = pnand %p788_p9, %p1250_p1  ;;  %p874_p12 = scmp.ne.s32.totalorder %s1248_s1, %s873_s26 }
  0x13   : > { %p880_p5 = scmp.lt.u32.totalorder %s873_s26, %s1248_s1 }
  0x14   : > { %p875_p13 = pneg %p1080_p11 }
  0x16   : > { %p876_p0 = pnand %p875_p13, %p874_p12 }
  0x18   : > { %p877_p3 = pneg %p876_p0 }
  0x1a   : > { %p882_p7 = pnand %p880_p5, %p877_p3 }
  0x1c   : > { %885 = shalt.err (!%p882_p7)
}
  0x1d   : > { %s886_s3 = scalar_lea.vmem %s1073_s19, 3072  ;;  %p894_p2 = scmp.lt.s32.totalorder %s1073_s19, %s1073_s19 }
  0x1e   : > { %p887_p9 = scmp.ne.s32.totalorder %s1073_s19, %s886_s3  ;;  %p895_p6 = scmp.lt.s32.totalorder %s886_s3, %s886_s3 }
  0x20   : > { %p889_p10 = pnand %p887_p9, %p875_p13  ;;  %p896_p4 = por %p895_p6, %p894_p2 }
  0x22   : > { %p890_p1 = pneg %p889_p10 }
  0x24   : > { %p897_p8 = pnand %p896_p4, %p890_p1 }
  0x26   : > { %900 = shalt.err (!%p897_p8)
}
  0x27   : > { %s1004_s4 = smov 64   ;;  %s1005_s5 = smov 4  }
  0x28   : > { %791 = dma.hbm_to_vmem [thread:$0]  (!%p1080_p11), %s1248_s1, 3072, %s1073_s19, [#allocation6], %s1004_s4, %s1004_s4, %s1005_s5  }
  0x29   : > { %p24_p2 = scmp.eq.s32.totalorder %s23_s23, 0  ;;  %p33_p1 = scmp.ne.s32.totalorder %s997_s11, %s993_s10 }
  0x2a   : > { %p34_p4 = scmp.eq.s32.totalorder %s1001_s12, 0  ;;  %p801_p6 = scmp.lt.s32.totalorder %s1001_s12, 2 }
  0x2b   : > { %s1116_s8 = scalar_select %p24_p2, %s997_s11, %s26_s22  }
  0x2c   : > { %p35_p8 = por %p34_p4, %p33_p1  ;;  %p1257_p10 = scmp.eq.s32.totalorder %s1050_s13, 1 }
  0x2d   : > { %s123_s18 = sand.u32 1, %s997_s11   ;;  %s778_s24 = smul.u32 384, %s1001_s12 }
  0x2e   : > { %p1120_p12 = por %p1257_p10, %p33_p1  ;;  %s777_s25 = smul.u32 24, %s123_s18 }
  0x2f   : > { %p1126_p13 = pnand %p801_p6, %p35_p8  ;;  %s1133_s22 = scalar_lea.hbm %s1247_s0, %s778_s24 }
  0x30   : > { %s127_s26 = scalar_lea.vmem [#allocation2], %s777_s25  ;;  %s124_s28 = scalar_lea.sflag [#allocation3], %s123_s18 }
  0x31   : > { %s135_s27 = sshll.u32 %s127_s26, 4  ;;  %s901_s29 = scalar_lea.hbm %s1133_s22, 384  ;;  %s1135_s27 = int_to_ptr.vmem [resolvable:$true] %s135_s27 }
  0x32   : > { %p902_p11 = scmp.ne.s32.totalorder %s1133_s22, %s901_s29  ;;  %p903_p0 = pneg %p1126_p13 }
  0x33   : > { %s906_s4 = scalar_lea.hbm %s1247_s0, 768  ;;  %p907_p7 = scmp.lt.u32.totalorder %s1133_s22, %s1247_s0 }
  0x34   : > { %p904_p3 = pnand %p903_p0, %p902_p11  ;;  %p908_p9 = scmp.lt.u32.totalorder %s906_s4, %s901_s29 }
  0x35   : > { %p910_p1 = scmp.lt.u32.totalorder %s901_s29, %s1133_s22 }
  0x36   : > { %p905_p5 = pneg %p904_p3  ;;  %p909_p2 = por %p908_p9, %p907_p7 }
  0x38   : > { %p911_p4 = por %p910_p1, %p909_p2 }
  0x3a   : > { %p912_p6 = pnand %p911_p4, %p905_p5 }
  0x3c   : > { %915 = shalt.err (!%p912_p6)
}
  0x3d   : > { %s916_s7 = scalar_lea.vmem %s1135_s27, 384  ;;  %s1006_s18 = smov [#allocation2]  }
  0x3e   : > { %p917_p8 = scmp.ne.s32.totalorder %s1135_s27, %s916_s7  ;;  %s921_s24 = sshll.u32 %s1006_s18, 4  ;;  %s922_s24 = int_to_ptr.vmem [resolvable:$false] %s921_s24 }
  0x3f   : > { %s923_s25 = scalar_lea.vmem %s922_s24, 768  ;;  %p924_p3 = scmp.lt.s32.totalorder %s1135_s27, %s922_s24 }
  0x40   : > { %p919_p10 = pnand %p917_p8, %p903_p0  ;;  %p925_p7 = scmp.lt.s32.totalorder %s923_s25, %s916_s7 }
  0x42   : > { %p920_p11 = pneg %p919_p10  ;;  %p926_p9 = por %p925_p7, %p924_p3 }
  0x44   : > { %p927_p2 = pnand %p926_p9, %p920_p11 }
  0x46   : > { %930 = shalt.err (!%p927_p2)
}
  0x47   : > { %795 = dma.hbm_to_vmem [thread:$0]  (!%p1126_p13), %s1133_s22, 384, %s1135_s27, %s124_s28  }
  0x48   : > { %p1260_p5 = scmp.ne.s32.totalorder %s1255_s17, 0 }
  0x49   : > { %s1165_s19 = sand.u32 (!%p1260_p5), 1, %s993_s10   ;;  %p1261_p0 = scmp.ne.s32.totalorder (!%p1260_p5), %s1253_s15, 0 }
  0x4a   : > { %144 = sbr.rel (%p1260_p5) target bundleno = 1066 (0x42a), region = 28  ;;  %s147_s26 = scalar_lea.sflag (!%p1260_p5), [#allocation3], %s1165_s19 }
  0x4b   : > { %s779_s23 = smul.u32 (!%p1260_p5), 24, %s1165_s19 }
  0x4d   : > { %s1169_s29 = scalar_lea.vmem (!%p1260_p5), [#allocation2], %s779_s23 }
  0x51   : > { %976 = dma.done.wait (%p1261_p0), %s147_s26, 384  }
  0x52   : > { %978 = vsyncadd (%p1261_p0), %s147_s26, 4294966912  ;;  %p1262_p13 = scmp.eq.s32.totalorder %s1050_s13, 0 }
  0x54   : > { %980 = dma.done.wait (%p1262_p13), [#allocation6], 3072   ;;  %p1263_p1 = pmov %p1262_p13 }
  0x55   : > { %v1007_v0 = vmov 0.0   ;;  %vm1008_vm0 = vmmov 0   ;;  %v845_v1 = vld [vmem:[#allocation5 + $0x40] sm:$0xff]   ;;  %v848_v4 = vld [vmem:[#allocation5 + $0x48] sm:$0xff]   ;;  %v851_v7 = vld [vmem:[#allocation5 + $0x50] sm:$0xff]   ;;  %s1009_s15 = smov 64   ;;  %v455_v46 = vlaneseq }
  0x56   : > { %982 = vsyncadd (%p1263_p1), [#allocation6], 4294964224  ;;  %745 = vmatprep.subr.bf16.mxu1 %v1007_v0  ;;  %761 = vmatprep.mubr.msk.bf16.mxu1 %vm1008_vm0, %v1007_v0  ;;  %v846_v2 = vld [vmem:[#allocation5] sm:$0xff]   ;;  %v849_v5 = vld [vmem:[#allocation5 + $0x8] sm:$0xff]   ;;  %s1010_s17 = smov 96   ;;  %vm527_vm1 = vcmask 1043456  }
  0x57   : > { %710 = vmatprep.subr.bf16.mxu0 %v845_v1  ;;  %v847_v3 = vld [vmem:[#allocation5 + $0x80] sm:$0xff]   ;;  %v850_v6 = vld [vmem:[#allocation5 + $0x88] sm:$0xff]   ;;  %v852_v8 = vld [vmem:[#allocation5 + $0x10] sm:$0xff]   ;;  %vm464_vm2 = vcmask 261120   ;;  %v456_v47 = vshrl.u32 %v455_v46, 7  ;;  %v458_v48 = vand.u32 127, %v455_v46 }
  0x58   : > { %711 = vmatpush3.bf16.msra.mxu0 %v846_v2  ;;  %746 = vmatpush3.bf16.msra.mxu1 %v847_v3  ;;  %v853_v9 = vld [vmem:[#allocation5 + $0x90] sm:$0xff]   ;;  %v854_v10 = vld [vmem:[#allocation5 + $0x58] sm:$0xff]   ;;  %v857_v13 = vld [vmem:[#allocation5 + $0x60] sm:$0xff]   ;;  %v1011_v49 = vmov -1e+30   ;;  %vm511_vm4 = vcmask 64512  }
  0x59   : > { %712 = vmatprep.subr.bf16.mxu0 %v848_v4  ;;  %747 = vmatprep.subr.bf16.mxu1 %v1007_v0  ;;  %v855_v11 = vld [vmem:[#allocation5 + $0x18] sm:$0xff]   ;;  %v858_v14 = vld [vmem:[#allocation5 + $0x20] sm:$0xff]   ;;  %v860_v16 = vld [vmem:[#allocation5 + $0x68] sm:$0xff]   ;;  %vm459_vm3 = vcmp.le.s32.totalorder %v458_v48, %v456_v47  ;;  %s679_s20 = sshll.u32 %s1165_s19, 2  ;;  %s707_s22 = sshll.u32 %s1050_s13, 6  ;;  %vm574_vm5 = vcmask 257024  }
  0x5a   : > { %v856_v12 = vld [vmem:[#allocation5 + $0x98] sm:$0xff]   ;;  %v859_v15 = vld [vmem:[#allocation5 + $0xa0] sm:$0xff]   ;;  %v861_v17 = vld [vmem:[#allocation5 + $0x28] sm:$0xff]   ;;  %v460_v50 = vsel %vm459_vm3, 0.0, %v1011_v49  ;;  %s174_s27 = scalar_lea.vmem [#allocation7], %s679_s20  ;;  %vm576_vm6 = vcmask 1043712   ;;  %s1203_s4 = scalar_lea.hbm %s1249_s2, %s707_s22 }
  0x5b   : > { %v862_v18 = vld [vmem:[#allocation5 + $0xa8] sm:$0xff]   ;;  %v863_v19 = vld [vmem:[#allocation5 + $0x70] sm:$0xff]   ;;  %v866_v22 = vld [vmem:[#allocation5 + $0x78] sm:$0xff]   ;;  %s592_s28 = sshll.u32 %s174_s27, 4  ;;  %s579_s13 = scalar_lea.sflag [#allocation4], %s1165_s19  ;;  %s1205_s28 = int_to_ptr.vmem [resolvable:$true] %s592_s28 }
  0x5c   : > { %713 = vmatpush3.bf16.msra.mxu0 %v849_v5  ;;  %748 = vmatpush3.bf16.msra.mxu1 %v850_v6  ;;  %v864_v20 = vld [vmem:[#allocation5 + $0x30] sm:$0xff]   ;;  %v867_v25 = vld [vmem:[#allocation5 + $0x38] sm:$0xff]   ;;  %s931_s5 = scalar_lea.vmem %s1205_s28, 64  ;;  %s1013_s6 = smov [#allocation7]  }
  0x5d   : > { %714 = vmatprep.subr.bf16.mxu0 %v851_v7  ;;  %749 = vmatprep.subr.bf16.mxu1 %v1007_v0  ;;  %v865_v21 = vld [vmem:[#allocation5 + $0xb0] sm:$0xff]   ;;  %v868_v27 = vld [vmem:[#allocation5 + $0xb8] sm:$0xff]   ;;  %v1012_v7 = vmov 0   ;;  %p932_p4 = scmp.ne.s32.totalorder %s1205_s28, %s931_s5  ;;  %s935_s7 = sshll.u32 %s1013_s6, 4  ;;  %s936_s7 = int_to_ptr.vmem [resolvable:$false] %s935_s7 }
  0x5e   : > { %v177_v23 = vld [vmem:[%s1169_s29 + $0x8] sm:$0xff]  ;;  %v176_v26 = vld [vmem:[%s1169_s29] sm:$0xff]  ;;  %v178_v28 = vld [vmem:[%s1169_s29 + $0x10] sm:$0xff]  ;;  %s937_s18 = scalar_lea.vmem %s936_s7, 128  ;;  %p938_p10 = scmp.lt.s32.totalorder %s1205_s28, %s936_s7 }
  0x5f   : > { %v180_v24 = vpack.c.bf16 %v177_v23, %v177_v23  ;;  %v179_v29 = vpack.c.bf16 %v176_v26, %v176_v26  ;;  %v181_v30 = vpack.c.bf16 %v178_v28, %v178_v28  ;;  %p933_p6 = pnand %p932_p4, %p1120_p12  ;;  %p939_p11 = scmp.lt.s32.totalorder %s937_s18, %s931_s5 }
  0x60   : > { %715 = vmatpush3.bf16.msra.mxu0 %v852_v8  ;;  %750 = vmatpush3.bf16.msra.mxu1 %v853_v9 }
  0x61   : > { %716 = vmatprep.subr.bf16.mxu0 %v854_v10  ;;  %751 = vmatprep.subr.bf16.mxu1 %v1007_v0  ;;  %p934_p8 = pneg %p933_p6  ;;  %p940_p3 = por %p939_p11, %p938_p10 }
  0x62   : > { %406 = vmatprep.mubr.bf16.mxu0 %v180_v24 }
  0x63   : > { %p941_p7 = pnand %p940_p3, %p934_p8 }
  0x64   : > { %717 = vmatpush3.bf16.msra.mxu0 %v855_v11  ;;  %752 = vmatpush3.bf16.msra.mxu1 %v856_v12 }
  0x65   : > { %718 = vmatprep.subr.bf16.mxu0 %v857_v13  ;;  %753 = vmatprep.subr.bf16.mxu1 %v1007_v0 }
  0x68   : > { %719 = vmatpush3.bf16.msra.mxu0 %v858_v14  ;;  %754 = vmatpush3.bf16.msra.mxu1 %v859_v15 }
  0x69   : > { %720 = vmatprep.subr.bf16.mxu0 %v860_v16  ;;  %755 = vmatprep.subr.bf16.mxu1 %v1007_v0 }
  0x6c   : > { %721 = vmatpush3.bf16.msra.mxu0 %v861_v17  ;;  %756 = vmatpush3.bf16.msra.mxu1 %v862_v18 }
  0x6d   : > { %722 = vmatprep.subr.bf16.mxu0 %v863_v19  ;;  %757 = vmatprep.subr.bf16.mxu1 %v1007_v0 }
  0x70   : > { %723 = vmatpush3.bf16.msra.mxu0 %v864_v20  ;;  %758 = vmatpush3.bf16.msra.mxu1 %v865_v21 }
  0x71   : > { %724 = vmatprep.subr.bf16.mxu0 %v866_v22  ;;  %759 = vmatprep.subr.bf16.mxu1 %v1007_v0 }
  0x74   : > { %725 = vmatpush3.bf16.msra.mxu0 %v867_v25  ;;  %760 = vmatpush3.bf16.msra.mxu1 %v868_v27 }
  0x75   : > { %765 = vmatprep.subr.bf16.mxu0 %v1007_v0  ;;  %771 = vmatprep.subr.bf16.mxu1 %v1007_v0 }
  0x77   : > { %407 = vmatmul.mubr.bf16.vlgmr.msra.gmra.mrb[0].mxu0 %v179_v29  ;;  %762 = vmatmul.mubr.bf16.vlgmr.msra.gmra.mrb[0].mxu1 %v181_v30 }
  0x78   : > { %767 = vmatprep.mubr.msk.bf16.mxu0 %vm1008_vm0, %v1007_v0  ;;  %773 = vmatprep.mubr.msk.bf16.mxu1 %vm1008_vm0, %v1007_v0 }
 0x14a   : > { %v726_v31 = vpop.f32.mrb[0].mxu0  ;;  %v448_v32 = vpop.f32.mrb[0].mxu1 }
 0x14b   : > { %v727_v33 = vpop.f32.mrb[1].mxu0  ;;  %v763_v35 = vpop.f32.mrb[1].mxu1 }
 0x14c   : > { %v728_v34 = vadd.f32 %v727_v33, %v726_v31  ;;  %v729_v36 = vpop.f32.mrb[2].mxu0  ;;  %v451_v37 = vpop.f32.mrb[2].mxu1 }
 0x14d   : > { %v730_v38 = vpop.f32.mrb[3].mxu0  ;;  %v764_v40 = vpop.f32.mrb[3].mxu1 }
 0x14e   : > { %v449_v39 = vadd.f32 %v728_v34, %v448_v32 }
 0x150   : > { %v454_v41 = vpack.c.bf16 %v449_v39, %v449_v39 }
 0x152   : > { %522 = vrot.lane.b32.xlu1 %v454_v41, %s1009_s15  ;;  %462 = vrot.lane.b32.xlu0 %v454_v41, %s1010_s17 }
 0x1c4   : > { %v523_v42 = vpop.permute.xlu1 %522  ;;  %v463_v43 = vpop.permute.xlu0 %462 }
 0x1c5   : > { %v529_v44 = vsel %vm527_vm1, %v523_v42, 0  ;;  %v469_v45 = vsel %vm464_vm2, %v463_v43, 0 }
 0x1c6   : > { %766 = vmatpush3.bf16.xpose.msra.mxu0 %v469_v45  ;;  %772 = vmatpush3.bf16.msra.mxu1 %v529_v44 }
 0x1cd   : > { %768 = vmatmul.mubr.msk.bf16.vlgmr.msra.gmra.mrb[4].mxu0 %vm464_vm2, %v454_v41 }
 0x2a0   : > { %v505_v51 = vpop.f32.mrb[4].mxu0 }
 0x2a1   : > { %v506_v52 = vadd.f32 %v505_v51, %v460_v50  ;;  %v769_v53 = vpop.f32.mrb[5].mxu0 }
 0x2a2   : > { %v508_v54 = vpop.f32.mrb[6].mxu0 }
 0x2a3   : > { %v770_v55 = vpop.f32.mrb[7].mxu0  ;;  %v512_v56 = vsel %vm511_vm4, %v506_v52, -inf }
 0x2a4   : > { %513 = vmax.xlane.f32.xlu0 %v512_v56 }
 0x331   : > { %v514_v57 = vpop.xlane.xlu0 %513 }
 0x332   : > { %v515_v58 = vsub.f32 %v506_v52, %v514_v57 }
 0x334   : > { %v516_v59 = vmul.f32 1.442695, %v515_v58 }
 0x336   : > { %869 = vpow2.f32 %v516_v59 }
 0x340   : > { %v870_v60 = vpop.eup %869 }
 0x341   : > { %v518_v61 = vsel %vm511_vm4, %v870_v60, 0.0  ;;  %v521_v62 = vpack.c.bf16 %v870_v60, %v870_v60 }
 0x342   : > { %519 = vadd.xlane.f32.xlu1 %v518_v61 }
 0x343   : > { %774 = vmatmul.mubr.msk.bf16.vlgmr.msra.gmra.mrb[4].mxu1 %vm511_vm4, %v521_v62 }
 0x3cf   : > { %v520_v63 = vpop.xlane.xlu1 %519 }
 0x3d0   : > { %871 = vrcp.f32 %v520_v63 }
 0x3da   : > { %v872_v0 = vpop.eup %871 }
 0x416   : > { %v565_v1 = vpop.f32.mrb[4].mxu1 }
 0x417   : > { %v572_v2 = vmul.f32 %v872_v0, %v565_v1  ;;  %v775_v3 = vpop.f32.mrb[5].mxu1 }
 0x418   : > { %v568_v4 = vpop.f32.mrb[6].mxu1 }
 0x419   : > { %v573_v5 = vpack.c.bf16 %v572_v2, %v572_v2  ;;  %v776_v6 = vpop.f32.mrb[7].mxu1 }
 0x41b   : > { %575 = vst.msk [vmem:[%s174_s27] sm:$0xf] %vm574_vm5, %v573_v5 }
 0x41c   : > { %577 = vst.msk [vmem:[%s174_s27] sm:$0xf] %vm576_vm6, %v1012_v7 }
 0x41d   : > { %944 = shalt.err (!%p941_p7)
}
 0x41e   : > { %s945_s24 = scalar_lea.hbm %s1203_s4, 64  ;;  %s949_s23 = scalar_lea.hbm %s1249_s2, 128 }
 0x41f   : > { %p946_p9 = scmp.ne.s32.totalorder %s1203_s4, %s945_s24  ;;  %p950_p0 = scmp.lt.u32.totalorder %s1203_s4, %s1249_s2 }
 0x420   : > { %p951_p13 = scmp.lt.u32.totalorder %s949_s23, %s945_s24  ;;  %p953_p4 = scmp.lt.u32.totalorder %s945_s24, %s1203_s4 }
 0x421   : > { %p947_p2 = pnand %p946_p9, %p1120_p12 }
 0x422   : > { %p952_p1 = por %p951_p13, %p950_p0 }
 0x423   : > { %p948_p5 = pneg %p947_p2 }
 0x424   : > { %p954_p6 = por %p953_p4, %p952_p1 }
 0x426   : > { %p955_p8 = pnand %p954_p6, %p948_p5 }
 0x428   : > { %958 = shalt.err (!%p955_p8)
}
 0x429   : > { %786 = dma.vmem_to_hbm [thread:$0]  (%p1120_p12), %s1205_s28, 64, %s1203_s4, %s579_s13  }
 0x42a PF: > { %s604_s15 = sand.u32 1, %s989_s9   ;;  %p1264_p10 = scmp.ne.s32.totalorder %s1254_s16, 0 }
 0x42b   : > { %p1265_p11 = scmp.ge.s32.totalorder %s1001_s12, 2  ;;  %s605_s17 = scalar_lea.sflag [#allocation4], %s604_s15 }
 0x42d   : > { %p797_p3 = pnand %p1265_p11, %p1264_p10 }
 0x42f   : > { %984 = dma.done.wait (!%p797_p3), %s605_s17, 64  }
 0x430   : > { %986 = vsyncadd (!%p797_p3), %s605_s17, 4294967232  ;;  %p16_p7 = scmp.ge.s32.totalorder %s1085_s21, 4   ;;  %s1266_s9 = smov %s993_s10 }
 0x431   : > { %s1267_s10 = smov %s997_s11  ;;  %s1268_s11 = smov %s1116_s8 }
 0x432   : > { %s1269_s12 = smov %s1085_s21  ;;  %18 = sbr.rel (!%p16_p7) target bundleno = 6 (0x6), region = 77 }
 0x439   :  { %610 = vsyncpa [#allocation3], 1 }
 0x43a   :  { %612 = vsyncpa [#allocation3 + $0x1], 1 }
 0x43b   :  { %613 = vsyncpa [#allocation6], 1 }
 0x43c   :  { %614 = vsyncpa [#allocation4], 1 }
 0x43d   :  { %616 = vsyncpa [#allocation4 + $0x1], 1 }

</bundles_post_ra>
